<compile_context>
chip_gen: v7x
topology: tpu7x:2x2x1
jax: 0.10.0
libtpu: 0.0.40
codegen_flags: <defaults>
</compile_context>

<pallas_src>
import functools

import jax
import jax.numpy as jnp
from jax.experimental import pallas as pl
from jax.experimental.pallas import tpu as pltpu


def _rope_kernel(q_ref, k_ref, cos_ref, sin_ref, qo_ref, ko_ref):
    # q_ref/k_ref: (TBH, TS, D) tile; cos_ref/sin_ref: (TS, D) f32 tables
    # (sin is pre-signed:  sin_signed[s, d] = sin[s, d] * (-1 if d < D/2 else +1)).
    q = q_ref[...].astype(jnp.float32)
    k = k_ref[...].astype(jnp.float32)
    cos = cos_ref[...][None, :, :]          # (1, TS, D), already f32
    sin = sin_ref[...][None, :, :]

    half = q.shape[-1] // 2
    axis = q.ndim - 1                       # pltpu.roll requires a positive axis

    # rotate_half(x) = concat(-x2, x1) == roll(x, D/2, lane axis) * sign,
    # with the sign folded into the pre-signed sin table.
    qo_ref[...] = (q * cos + pltpu.roll(q, shift=half, axis=axis) * sin).astype(qo_ref.dtype)
    ko_ref[...] = (k * cos + pltpu.roll(k, shift=half, axis=axis) * sin).astype(ko_ref.dtype)


def _build_rope_tables(seq_len, d_model, base=10000.0):
    """Replicates RoPE._build_cache, returning (cos, sin_signed) in float32.

    sin_signed already carries the rotate_half sign pattern so the kernel can
    use a plain lane roll:  rotate_half(x) * sin == roll(x, D/2) * sin_signed.
    """
    inv_freq = 1.0 / (base ** (jnp.arange(0, d_model, 2, dtype=jnp.float32) / d_model))
    t = jnp.arange(seq_len, dtype=jnp.float32)
    freqs = jnp.einsum("i,j->ij", t, inv_freq)          # (S, D/2)
    emb = jnp.concatenate([freqs, freqs], axis=-1)      # (S, D)
    cos = jnp.cos(emb)
    sin = jnp.sin(emb)
    half = d_model // 2
    sign = jnp.concatenate(
        [-jnp.ones((half,), jnp.float32), jnp.ones((half,), jnp.float32)]
    )
    return cos, sin * sign[None, :]


def _pick_tile(n, limit, align=1):
    """Largest divisor of n that is <= limit and a multiple of `align`.

    Returns n itself when n <= limit (full-extent blocks are always legal) or
    when no aligned divisor exists.
    """
    if n <= limit:
        return n
    best = 0
    d = align
    while d <= limit:
        if n % d == 0:
            best = d
        d += align
    return best if best > 0 else n


@functools.partial(jax.jit, static_argnames=("base",))
def rope_forward(q, k, cos=None, sin_signed=None, *, base=10000.0):
    """Apply RoPE to q and k of shape [B, H, S, D]. Returns (q_rot, k_rot).

    cos / sin_signed may be passed in (built once per model via
    _build_rope_tables); if omitted they are built here.
    """
    B, H, S, D = q.shape
    assert D % 2 == 0, "head_dim must be even for RoPE"
    if cos is None or sin_signed is None:
        cos, sin_signed = _build_rope_tables(S, D, base=base)
    cos = cos[:S].astype(jnp.float32)
    sin_signed = sin_signed[:S].astype(jnp.float32)

    BH = B * H
    qf = q.reshape(BH, S, D)
    kf = k.reshape(BH, S, D)

    # ~1 MiB per streamed (TBH, TS, D) buffer: big enough to amortize the
    # per-grid-step overhead, small enough that double-buffered q/k/qo/ko plus
    # the resident cos/sin tiles stay well under the v7x 64 MiB VMEM budget.
    itemsize = jnp.dtype(q.dtype).itemsize
    target_bytes = 1 << 20
    max_ts = max(8, min(S, target_bytes // (D * itemsize)))
    ts = _pick_tile(S, max_ts, align=8)
    max_tbh = max(1, target_bytes // (ts * D * itemsize))
    tbh = _pick_tile(BH, max_tbh, align=1)

    grid = (S // ts, BH // tbh)             # BH is the inner (fastest) axis

    qk_spec = pl.BlockSpec((tbh, ts, D), lambda s, bh: (bh, s, 0))
    tbl_spec = pl.BlockSpec((ts, D), lambda s, bh: (s, 0))  # constant over inner loop

    qo, ko = pl.pallas_call(
        _rope_kernel,
        out_shape=(
            jax.ShapeDtypeStruct((BH, S, D), q.dtype),
            jax.ShapeDtypeStruct((BH, S, D), k.dtype),
        ),
        grid_spec=pltpu.PrefetchScalarGridSpec(
            num_scalar_prefetch=0,
            grid=grid,
            in_specs=[qk_spec, qk_spec, tbl_spec, tbl_spec],
            out_specs=[qk_spec, qk_spec],
        ),
        compiler_params=pltpu.CompilerParams(
            dimension_semantics=("parallel", "parallel"),
            vmem_limit_bytes=48 * 1024 * 1024,
        ),
    )(qf, kf, cos, sin_signed)

    return qo.reshape(B, H, S, D), ko.reshape(B, H, S, D)


def _rope_reference(q, k, *, base=10000.0):
    """Pure-JAX reference mirroring the PyTorch forward exactly."""
    B, H, S, D = q.shape
    inv_freq = 1.0 / (base ** (jnp.arange(0, D, 2, dtype=jnp.float32) / D))
    t = jnp.arange(S, dtype=jnp.float32)
    freqs = jnp.einsum("i,j->ij", t, inv_freq)
    emb = jnp.concatenate([freqs, freqs], axis=-1)
    cos = jnp.cos(emb)[None, None, :, :]
    sin = jnp.sin(emb)[None, None, :, :]

    def rotate_half(x):
        x1, x2 = x[..., : D // 2], x[..., D // 2:]
        return jnp.concatenate([-x2, x1], axis=-1)

    q_rot = (q * cos + rotate_half(q) * sin).astype(q.dtype)
    k_rot = (k * cos + rotate_half(k) * sin).astype(k.dtype)
    return q_rot, k_rot


if __name__ == "__main__":
    key = jax.random.PRNGKey(0)
    kq, kk = jax.random.split(key)

    # [batch, num_heads, seq_len, head_dim]
    B, H, S, D = 2, 4, 8, 32
    q = jax.random.normal(kq, (B, H, S, D), dtype=jnp.float32)
    k = jax.random.normal(kk, (B, H, S, D), dtype=jnp.float32)

    # Build the tables once (as the PyTorch module does in __init__).
    cos, sin_signed = _build_rope_tables(S, D)

    q_rot, k_rot = rope_forward(q, k, cos, sin_signed)
    jax.block_until_ready((q_rot, k_rot))

    q_ref, k_ref = _rope_reference(q, k)
    assert jnp.allclose(q_rot, q_ref, atol=1e-5, rtol=1e-5)
    assert jnp.allclose(k_rot, k_ref, atol=1e-5, rtol=1e-5)

    print("KERNEL_OK")
</pallas_src>

<mosaic_0001>
module attributes {stable_mosaic.version = 11 : i64} {
  func.func @_rope_kernel(%arg0: i32, %arg1: i32, %arg2: memref<8x8x32xf32, #tpu.memory_space<vmem>>, %arg3: memref<8x8x32xf32, #tpu.memory_space<vmem>>, %arg4: memref<8x32xf32, #tpu.memory_space<vmem>>, %arg5: memref<8x32xf32, #tpu.memory_space<vmem>>, %arg6: memref<8x8x32xf32, #tpu.memory_space<vmem>>, %arg7: memref<8x8x32xf32, #tpu.memory_space<vmem>>) attributes {dimension_semantics = [#tpu.dimension_semantics<parallel>, #tpu.dimension_semantics<parallel>], iteration_bounds = array<i64: 1, 1>, scalar_prefetch = 0 : i64, scratch_operands = 0 : i64, tpu.core_type = #tpu.core_type<tc>, window_params = [{transform_indices = @transform_0, window_bounds = array<i64: 8, 8, 32>}, {transform_indices = @transform_1, window_bounds = array<i64: 8, 8, 32>}, {transform_indices = @transform_2, window_bounds = array<i64: 8, 32>}, {transform_indices = @transform_3, window_bounds = array<i64: 8, 32>}, {transform_indices = @transform_4, window_bounds = array<i64: 8, 8, 32>}, {transform_indices = @transform_5, window_bounds = array<i64: 8, 8, 32>}]} {
    %c0 = arith.constant 0 : index
    %c0_0 = arith.constant 0 : index
    %c0_1 = arith.constant 0 : index
    %0 = vector.load %arg2[%c0, %c0_0, %c0_1] : memref<8x8x32xf32, #tpu.memory_space<vmem>>, vector<8x8x32xf32>
    %c0_2 = arith.constant 0 : index
    %c0_3 = arith.constant 0 : index
    %c0_4 = arith.constant 0 : index
    %1 = vector.load %arg3[%c0_2, %c0_3, %c0_4] : memref<8x8x32xf32, #tpu.memory_space<vmem>>, vector<8x8x32xf32>
    %c0_5 = arith.constant 0 : index
    %c0_6 = arith.constant 0 : index
    %2 = vector.load %arg4[%c0_5, %c0_6] : memref<8x32xf32, #tpu.memory_space<vmem>>, vector<8x32xf32>
    %3 = vector.shape_cast %2 : vector<8x32xf32> to vector<1x8x32xf32>
    %c0_7 = arith.constant 0 : index
    %c0_8 = arith.constant 0 : index
    %4 = vector.load %arg5[%c0_7, %c0_8] : memref<8x32xf32, #tpu.memory_space<vmem>>, vector<8x32xf32>
    %5 = vector.shape_cast %4 : vector<8x32xf32> to vector<1x8x32xf32>
    %6 = vector.broadcast %3 : vector<1x8x32xf32> to vector<8x8x32xf32>
    %7 = arith.mulf %0, %6 : vector<8x8x32xf32>
    %c16_i32 = arith.constant 16 : i32
    %8 = tpu.dynamic_rotate %0 by %c16_i32 dim 2 : vector<8x8x32xf32>, i32 -> vector<8x8x32xf32>
    %9 = vector.broadcast %5 : vector<1x8x32xf32> to vector<8x8x32xf32>
    %10 = arith.mulf %8, %9 : vector<8x8x32xf32>
    %11 = arith.addf %7, %10 : vector<8x8x32xf32>
    %c0_9 = arith.constant 0 : index
    %c0_10 = arith.constant 0 : index
    %c0_11 = arith.constant 0 : index
    %12 = vector.load %arg6[%c0_9, %c0_10, %c0_11] : memref<8x8x32xf32, #tpu.memory_space<vmem>>, vector<8x8x32xf32>
    tpu.vector_store %arg6[%c0_9, %c0_10, %c0_11], %11 {strides = array<i32>} : memref<8x8x32xf32, #tpu.memory_space<vmem>>, vector<8x8x32xf32>,
    %13 = vector.broadcast %3 : vector<1x8x32xf32> to vector<8x8x32xf32>
    %14 = arith.mulf %1, %13 : vector<8x8x32xf32>
    %c16_i32_12 = arith.constant 16 : i32
    %15 = tpu.dynamic_rotate %1 by %c16_i32_12 dim 2 : vector<8x8x32xf32>, i32 -> vector<8x8x32xf32>
    %16 = vector.broadcast %5 : vector<1x8x32xf32> to vector<8x8x32xf32>
    %17 = arith.mulf %15, %16 : vector<8x8x32xf32>
    %18 = arith.addf %14, %17 : vector<8x8x32xf32>
    %c0_13 = arith.constant 0 : index
    %c0_14 = arith.constant 0 : index
    %c0_15 = arith.constant 0 : index
    %19 = vector.load %arg7[%c0_13, %c0_14, %c0_15] : memref<8x8x32xf32, #tpu.memory_space<vmem>>, vector<8x8x32xf32>
    tpu.vector_store %arg7[%c0_13, %c0_14, %c0_15], %18 {strides = array<i32>} : memref<8x8x32xf32, #tpu.memory_space<vmem>>, vector<8x8x32xf32>,
    return
  }
  func.func @transform_0(%arg0: i32, %arg1: i32) -> (i32, i32, i32) {
    %c0_i32 = arith.constant 0 : i32
    %c0_i32_0 = arith.constant 0 : i32
    return %arg1, %arg0, %c0_i32 : i32, i32, i32
  }
  func.func @transform_1(%arg0: i32, %arg1: i32) -> (i32, i32, i32) {
    %c0_i32 = arith.constant 0 : i32
    %c0_i32_0 = arith.constant 0 : i32
    return %arg1, %arg0, %c0_i32 : i32, i32, i32
  }
  func.func @transform_2(%arg0: i32, %arg1: i32) -> (i32, i32) {
    %c0_i32 = arith.constant 0 : i32
    %c0_i32_0 = arith.constant 0 : i32
    return %arg0, %c0_i32 : i32, i32
  }
  func.func @transform_3(%arg0: i32, %arg1: i32) -> (i32, i32) {
    %c0_i32 = arith.constant 0 : i32
    %c0_i32_0 = arith.constant 0 : i32
    return %arg0, %c0_i32 : i32, i32
  }
  func.func @transform_4(%arg0: i32, %arg1: i32) -> (i32, i32, i32) {
    %c0_i32 = arith.constant 0 : i32
    %c0_i32_0 = arith.constant 0 : i32
    return %arg1, %arg0, %c0_i32 : i32, i32, i32
  }
  func.func @transform_5(%arg0: i32, %arg1: i32) -> (i32, i32, i32) {
    %c0_i32 = arith.constant 0 : i32
    %c0_i32_0 = arith.constant 0 : i32
    return %arg1, %arg0, %c0_i32 : i32, i32, i32
  }
}

</mosaic_0001>

<bundles_post_ra>
// kernel: rope_forward.1
= control target key start
LH: loop header
LB: loop body
LE: loop exit
PB: predicated region body
PF: predicated region fallthrough
CT: control target
= control target key end

     0   :  { %11 = vsyncpa [#allocation3], 0  ;;  %s751_s0 = inlined_call_operand.hbm [shape: f32[8,8,32], index: 0, kind: input, shape index: {}]   ;;  %s752_s1 = inlined_call_operand.hbm [shape: f32[8,8,32], index: 1, kind: input, shape index: {}]   ;;  %s753_s2 = inlined_call_operand.vmem [shape: f32[8,32], index: 2, kind: input, shape index: {}]   ;;  %s754_s3 = inlined_call_operand.vmem [shape: f32[8,32], index: 3, kind: input, shape index: {}]   ;;  %s755_s4 = inlined_call_operand.hbm [shape: f32[8,8,32], index: 4, kind: output, shape index: {0}]   ;;  %s756_s5 = inlined_call_operand.hbm [shape: f32[8,8,32], index: 5, kind: output, shape index: {1}]  }
   0x1   :  { %12 = vsyncpa [#allocation6], 0 }
   0x2   :  { %13 = vsyncpa [#allocation4], 0 }
   0x3   :  { %14 = vsyncpa [#allocation9], 0  ;;  %s436_s18 = smov [#allocation2]   ;;  %s340_s22 = scalar_lea.hbm %s751_s0, 1024 }
   0x4   :  { %s20_s19 = sshll.u32 %s436_s18, 4  ;;  %p341_p0 = scmp.ne.s32.totalorder %s751_s0, %s340_s22  ;;  %s21_s19 = int_to_ptr.vmem [resolvable:$true] %s20_s19 }
   0x5   :  { %p344_p1 = scmp.lt.u32.totalorder %s340_s22, %s751_s0 }
   0x7   :  { %p346_p2 = pnand %p344_p1, %p341_p0 }
   0x9   :  { %349 = shalt.err (!%p346_p2)
}
   0xa   :  { %s350_s27 = scalar_lea.vmem %s21_s19, 1024  ;;  %p355_p4 = scmp.lt.s32.totalorder %s21_s19, %s21_s19 }
   0xb   :  { %p351_p3 = scmp.ne.s32.totalorder %s21_s19, %s350_s27  ;;  %p356_p5 = scmp.lt.s32.totalorder %s350_s27, %s350_s27 }
   0xd   :  { %p357_p6 = por %p356_p5, %p355_p4 }
   0xf   :  { %p358_p7 = pnand %p357_p6, %p351_p3 }
  0x11   :  { %361 = shalt.err (!%p358_p7)
}
  0x12   :  { %s437_s28 = smov 128   ;;  %s438_s29 = smov 8  }
  0x13   :  { %26 = dma.hbm_to_vmem [thread:$0]  %s751_s0, 1024, %s21_s19, [#allocation3], %s437_s28, %s437_s28, %s438_s29  }
  0x14   :  { %s439_s7 = smov [#allocation5]   ;;  %s362_s11 = scalar_lea.hbm %s752_s1, 1024 }
  0x15   :  { %s32_s8 = sshll.u32 %s439_s7, 4  ;;  %p363_p8 = scmp.ne.s32.totalorder %s752_s1, %s362_s11  ;;  %s33_s8 = int_to_ptr.vmem [resolvable:$true] %s32_s8 }
  0x16   :  { %p366_p9 = scmp.lt.u32.totalorder %s362_s11, %s752_s1 }
  0x18   :  { %p368_p10 = pnand %p366_p9, %p363_p8 }
  0x1a   :  { %371 = shalt.err (!%p368_p10)
}
  0x1b   :  { %s372_s16 = scalar_lea.vmem %s33_s8, 1024  ;;  %p377_p12 = scmp.lt.s32.totalorder %s33_s8, %s33_s8 }
  0x1c   :  { %p373_p11 = scmp.ne.s32.totalorder %s33_s8, %s372_s16  ;;  %p378_p13 = scmp.lt.s32.totalorder %s372_s16, %s372_s16 }
  0x1e   :  { %p379_p0 = por %p378_p13, %p377_p12 }
  0x20   :  { %p380_p1 = pnand %p379_p0, %p373_p11 }
  0x22   :  { %383 = shalt.err (!%p380_p1)
}
  0x23   :  { %38 = dma.hbm_to_vmem [thread:$0]  %s752_s1, 1024, %s33_s8, [#allocation6], %s437_s28, %s437_s28, %s438_s29  }
  0x24   :  { %428 = dma.done.wait [#allocation3], 1024  }
  0x25   :  { %429 = vsyncadd [#allocation3], 4294966272 }
  0x26   :  { %430 = dma.done.wait [#allocation6], 1024  }
  0x27   :  { %431 = vsyncadd [#allocation6], 4294966272  ;;  %v505_v0 = vld [vmem:[#allocation2] sm:$0xff]  ;;  %v507_v1 = vld [vmem:[#allocation2 + $0x10] sm:$0xff]  ;;  %s440_s18 = smov 32   ;;  %vm75_vm0 = vcmask 1047808  }
  0x28   :  { %76 = vrot.lane.b32.xlu0 %v505_v0, %s440_s18  ;;  %82 = vrot.lane.b32.xlu1 %v507_v1, %s440_s18  ;;  %v513_v2 = vld [vmem:[#allocation2 + $0x8] sm:$0xff]  ;;  %v515_v3 = vld [vmem:[#allocation2 + $0x18] sm:$0xff]  ;;  %v521_v4 = vld [vmem:[#allocation2 + $0x20] sm:$0xff]  ;;  %s441_s20 = smov 16   ;;  %vm176_vm1 = vcmask 261120  }
  0x29   :  { %v523_v5 = vld [vmem:[#allocation2 + $0x28] sm:$0xff]  ;;  %v529_v6 = vld [vmem:[#allocation2 + $0x30] sm:$0xff]  ;;  %v531_v7 = vld [vmem:[#allocation2 + $0x38] sm:$0xff] }
  0x2a   :  { %v537_v8 = vld [vmem:[#allocation5] sm:$0xff]  ;;  %v539_v9 = vld [vmem:[#allocation5 + $0x8] sm:$0xff]  ;;  %v545_v10 = vld [vmem:[#allocation5 + $0x10] sm:$0xff] }
  0x2b   :  { %v547_v11 = vld [vmem:[#allocation5 + $0x18] sm:$0xff]  ;;  %v553_v12 = vld [vmem:[#allocation5 + $0x20] sm:$0xff]  ;;  %v555_v13 = vld [vmem:[#allocation5 + $0x28] sm:$0xff] }
  0x2c   :  { %79 = vrot.lane.b32.xlu0 %v513_v2, %s440_s18  ;;  %85 = vrot.lane.b32.xlu1 %v515_v3, %s440_s18  ;;  %v561_v14 = vld [vmem:[#allocation5 + $0x30] sm:$0xff]  ;;  %v563_v15 = vld [vmem:[#allocation5 + $0x38] sm:$0xff]  ;;  %v66_v48 = vld [vmem:[%s754_s3] sm:$0xff]  ;;  %s442_s3 = smov 112  }
  0x30   :  { %88 = vrot.lane.b32.xlu0 %v521_v4, %s440_s18  ;;  %91 = vrot.lane.b32.xlu1 %v523_v5, %s440_s18 }
  0x34   :  { %94 = vrot.lane.b32.xlu0 %v529_v6, %s440_s18  ;;  %97 = vrot.lane.b32.xlu1 %v531_v7, %s440_s18 }
  0x38   :  { %193 = vrot.lane.b32.xlu0 %v537_v8, %s440_s18  ;;  %196 = vrot.lane.b32.xlu1 %v539_v9, %s440_s18 }
  0x3c   :  { %199 = vrot.lane.b32.xlu0 %v545_v10, %s440_s18  ;;  %202 = vrot.lane.b32.xlu1 %v547_v11, %s440_s18 }
  0x40   :  { %205 = vrot.lane.b32.xlu0 %v553_v12, %s440_s18  ;;  %208 = vrot.lane.b32.xlu1 %v555_v13, %s440_s18 }
  0x44   :  { %211 = vrot.lane.b32.xlu0 %v561_v14, %s440_s18  ;;  %214 = vrot.lane.b32.xlu1 %v563_v15, %s440_s18 }
  0x9a   :  { %v77_v16 = vpop.permute.xlu0 %76  ;;  %v83_v17 = vpop.permute.xlu1 %82 }
  0x9b   :  { %v78_v18 = vsel %vm75_vm0, %v77_v16, %v505_v0  ;;  %v84_v19 = vsel %vm75_vm0, %v83_v17, %v507_v1 }
  0x9c   :  { %100 = vrot.lane.b32.xlu0 %v78_v18, %s440_s18 }
  0x9e   :  { %v80_v20 = vpop.permute.xlu0 %79  ;;  %v86_v21 = vpop.permute.xlu1 %85 }
  0x9f   :  { %v81_v22 = vsel %vm75_vm0, %v80_v20, %v513_v2  ;;  %v87_v23 = vsel %vm75_vm0, %v86_v21, %v515_v3 }
  0xa0   :  { %104 = vrot.lane.b32.xlu0 %v84_v19, %s440_s18  ;;  %102 = vrot.lane.b32.xlu1 %v81_v22, %s440_s18 }
  0xa2   :  { %v89_v24 = vpop.permute.xlu0 %88  ;;  %v92_v25 = vpop.permute.xlu1 %91 }
  0xa3   :  { %v90_v26 = vsel %vm75_vm0, %v89_v24, %v521_v4  ;;  %v93_v27 = vsel %vm75_vm0, %v92_v25, %v523_v5 }
  0xa4   :  { %106 = vrot.lane.b32.xlu1 %v87_v23, %s440_s18  ;;  %108 = vrot.lane.b32.xlu0 %v90_v26, %s440_s18 }
  0xa6   :  { %v95_v28 = vpop.permute.xlu0 %94  ;;  %v98_v29 = vpop.permute.xlu1 %97 }
  0xa7   :  { %v96_v30 = vsel %vm75_vm0, %v95_v28, %v529_v6  ;;  %v99_v31 = vsel %vm75_vm0, %v98_v29, %v531_v7 }
  0xa8   :  { %110 = vrot.lane.b32.xlu1 %v93_v27, %s440_s18  ;;  %112 = vrot.lane.b32.xlu0 %v96_v30, %s440_s18 }
  0xaa   :  { %v194_v32 = vpop.permute.xlu0 %193  ;;  %v197_v33 = vpop.permute.xlu1 %196 }
  0xab   :  { %v195_v34 = vsel %vm75_vm0, %v194_v32, %v537_v8  ;;  %v198_v35 = vsel %vm75_vm0, %v197_v33, %v539_v9 }
  0xac   :  { %114 = vrot.lane.b32.xlu1 %v99_v31, %s440_s18  ;;  %217 = vrot.lane.b32.xlu0 %v195_v34, %s440_s18 }
  0xae   :  { %v200_v36 = vpop.permute.xlu0 %199  ;;  %v203_v37 = vpop.permute.xlu1 %202 }
  0xaf   :  { %v201_v38 = vsel %vm75_vm0, %v200_v36, %v545_v10  ;;  %v204_v39 = vsel %vm75_vm0, %v203_v37, %v547_v11 }
  0xb0   :  { %219 = vrot.lane.b32.xlu1 %v198_v35, %s440_s18  ;;  %221 = vrot.lane.b32.xlu0 %v201_v38, %s440_s18 }
  0xb2   :  { %v206_v40 = vpop.permute.xlu0 %205  ;;  %v209_v41 = vpop.permute.xlu1 %208 }
  0xb3   :  { %v207_v42 = vsel %vm75_vm0, %v206_v40, %v553_v12  ;;  %v210_v43 = vsel %vm75_vm0, %v209_v41, %v555_v13 }
  0xb4   :  { %223 = vrot.lane.b32.xlu1 %v204_v39, %s440_s18  ;;  %225 = vrot.lane.b32.xlu0 %v207_v42, %s440_s18 }
  0xb6   :  { %v212_v44 = vpop.permute.xlu0 %211  ;;  %v215_v45 = vpop.permute.xlu1 %214 }
  0xb7   :  { %v213_v46 = vsel %vm75_vm0, %v212_v44, %v561_v14  ;;  %v216_v47 = vsel %vm75_vm0, %v215_v45, %v563_v15 }
  0xb8   :  { %227 = vrot.lane.b32.xlu1 %v210_v43, %s440_s18  ;;  %229 = vrot.lane.b32.xlu0 %v213_v46, %s440_s18 }
  0xbc   :  { %231 = vrot.lane.b32.xlu1 %v216_v47, %s440_s18  ;;  %125 = vrot.lane.b32.xlu0 %v66_v48, %s441_s20 }
 0x10e   :  { %v101_v49 = vpop.permute.xlu0 %100 }
 0x10f   :  { %v116_v61 = vsel %vm75_vm0, %v101_v49, %v505_v0 }
 0x112   :  { %v105_v50 = vpop.permute.xlu0 %104  ;;  %v103_v53 = vpop.permute.xlu1 %102 }
 0x113   :  { %v117_v62 = vsel %vm75_vm0, %v103_v53, %v513_v2  ;;  %v118_v19 = vsel %vm75_vm0, %v105_v50, %v507_v1  ;;  %v671_v50 = vld [vmem:[%s753_s2] sm:$0xff]  ;;  %s443_s2 = smov [#allocation7]  }
 0x114   :  { %s302_s23 = sshll.u32 %s443_s2, 4  ;;  %s303_s23 = int_to_ptr.vmem [resolvable:$true] %s302_s23 }
 0x115   :  { %s384_s24 = scalar_lea.vmem %s303_s23, 1024  ;;  %p389_p3 = scmp.lt.s32.totalorder %s303_s23, %s303_s23 }
 0x116   :  { %v109_v51 = vpop.permute.xlu0 %108  ;;  %v107_v55 = vpop.permute.xlu1 %106  ;;  %p385_p2 = scmp.ne.s32.totalorder %s303_s23, %s384_s24  ;;  %p390_p4 = scmp.lt.s32.totalorder %s384_s24, %s384_s24 }
 0x117   :  { %v119_v18 = vsel %vm75_vm0, %v107_v55, %v515_v3  ;;  %v120_v24 = vsel %vm75_vm0, %v109_v51, %v521_v4  ;;  %v68_v51 = vmul.f32 %v671_v50, %v513_v2 }
 0x118   :  { %p391_p5 = por %p390_p4, %p389_p3 }
 0x11a   :  { %v113_v52 = vpop.permute.xlu0 %112  ;;  %v111_v58 = vpop.permute.xlu1 %110  ;;  %p392_p6 = pnand %p391_p5, %p385_p2 }
 0x11b   :  { %v121_v23 = vsel %vm75_vm0, %v111_v58, %v523_v5  ;;  %v122_v29 = vsel %vm75_vm0, %v113_v52, %v529_v6  ;;  %v67_v52 = vmul.f32 %v671_v50, %v505_v0  ;;  %v69_v58 = vmul.f32 %v671_v50, %v507_v1 }
 0x11c   :  { %v72_v0 = vmul.f32 %v671_v50, %v523_v5 }
 0x11e   :  { %v218_v54 = vpop.permute.xlu0 %217  ;;  %v115_v60 = vpop.permute.xlu1 %114 }
 0x11f   :  { %v123_v27 = vsel %vm75_vm0, %v115_v60, %v531_v7  ;;  %v233_v33 = vsel %vm75_vm0, %v218_v54, %v537_v8 }
 0x122   :  { %v222_v56 = vpop.permute.xlu0 %221  ;;  %v220_v20 = vpop.permute.xlu1 %219 }
 0x123   :  { %v234_v32 = vsel %vm75_vm0, %v220_v20, %v539_v9  ;;  %v235_v38 = vsel %vm75_vm0, %v222_v56, %v545_v10 }
 0x126   :  { %v226_v57 = vpop.permute.xlu0 %225  ;;  %v224_v28 = vpop.permute.xlu1 %223 }
 0x127   :  { %v236_v37 = vsel %vm75_vm0, %v224_v28, %v547_v11  ;;  %v237_v43 = vsel %vm75_vm0, %v226_v57, %v553_v12  ;;  %v70_v57 = vmul.f32 %v671_v50, %v515_v3 }
 0x12a   :  { %v230_v59 = vpop.permute.xlu0 %229  ;;  %v228_v34 = vpop.permute.xlu1 %227 }
 0x12b   :  { %v238_v41 = vsel %vm75_vm0, %v228_v34, %v555_v13  ;;  %v239_v47 = vsel %vm75_vm0, %v230_v59, %v561_v14 }
 0x12e   :  { %v126_v63 = vpop.permute.xlu0 %125  ;;  %v232_v42 = vpop.permute.xlu1 %231 }
 0x12f   :  { %v129_v16 = vmul.f32 %v126_v63, %v117_v62  ;;  %v128_v17 = vmul.f32 %v126_v63, %v116_v61  ;;  %v131_v21 = vmul.f32 %v126_v63, %v119_v18  ;;  %v130_v22 = vmul.f32 %v126_v63, %v118_v19 }
 0x130   :  { %v133_v25 = vmul.f32 %v126_v63, %v121_v23  ;;  %v132_v26 = vmul.f32 %v126_v63, %v120_v24  ;;  %v135_v30 = vmul.f32 %v126_v63, %v123_v27  ;;  %v134_v31 = vmul.f32 %v126_v63, %v122_v29 }
 0x131   :  { %146 = vrot.lane.b32.xlu0 %v129_v16, %s442_s3  ;;  %144 = vrot.lane.b32.xlu1 %v128_v17, %s442_s3  ;;  %v242_v35 = vmul.f32 %v234_v32, %v126_v63  ;;  %v241_v36 = vmul.f32 %v233_v33, %v126_v63  ;;  %v244_v39 = vmul.f32 %v236_v37, %v126_v63 }
 0x132   :  { %v243_v40 = vmul.f32 %v235_v38, %v126_v63  ;;  %v246_v44 = vmul.f32 %v238_v41, %v126_v63  ;;  %v245_v45 = vmul.f32 %v237_v43, %v126_v63  ;;  %v240_v46 = vsel %vm75_vm0, %v232_v42, %v563_v15 }
 0x133   :  { %v248_v48 = vmul.f32 %v240_v46, %v126_v63  ;;  %v247_v49 = vmul.f32 %v239_v47, %v126_v63  ;;  %v71_v62 = vmul.f32 %v671_v50, %v521_v4  ;;  %v74_v17 = vmul.f32 %v671_v50, %v531_v7 }
 0x134   :  { %v73_v18 = vmul.f32 %v671_v50, %v529_v6 }
 0x135   :  { %150 = vrot.lane.b32.xlu0 %v131_v21, %s442_s3  ;;  %148 = vrot.lane.b32.xlu1 %v130_v22, %s442_s3  ;;  %v186_v21 = vmul.f32 %v671_v50, %v539_v9  ;;  %v185_v22 = vmul.f32 %v671_v50, %v537_v8 }
 0x139   :  { %154 = vrot.lane.b32.xlu0 %v133_v25, %s442_s3  ;;  %152 = vrot.lane.b32.xlu1 %v132_v26, %s442_s3 }
 0x13d   :  { %158 = vrot.lane.b32.xlu0 %v135_v30, %s442_s3  ;;  %156 = vrot.lane.b32.xlu1 %v134_v31, %s442_s3 }
 0x141   :  { %259 = vrot.lane.b32.xlu0 %v242_v35, %s442_s3  ;;  %257 = vrot.lane.b32.xlu1 %v241_v36, %s442_s3 }
 0x145   :  { %263 = vrot.lane.b32.xlu0 %v244_v39, %s442_s3  ;;  %261 = vrot.lane.b32.xlu1 %v243_v40, %s442_s3 }
 0x149   :  { %267 = vrot.lane.b32.xlu0 %v246_v44, %s442_s3  ;;  %265 = vrot.lane.b32.xlu1 %v245_v45, %s442_s3 }
 0x14d   :  { %271 = vrot.lane.b32.xlu0 %v248_v48, %s442_s3  ;;  %269 = vrot.lane.b32.xlu1 %v247_v49, %s442_s3 }
 0x1a3   :  { %v147_v53 = vpop.permute.xlu0 %146  ;;  %v145_v54 = vpop.permute.xlu1 %144 }
 0x1a4   :  { %v169_v55 = vadd.f32 %v147_v53, %v68_v51  ;;  %v168_v56 = vadd.f32 %v145_v54, %v67_v52 }
 0x1a6   :  { %178 = vst.msk [vmem:[#allocation7 + $0x8] sm:$0xff] %vm176_vm1, %v169_v55  ;;  %177 = vst.msk [vmem:[#allocation7] sm:$0xff] %vm176_vm1, %v168_v56 }
 0x1a7   :  { %v151_v59 = vpop.permute.xlu0 %150  ;;  %v149_v2 = vpop.permute.xlu1 %148 }
 0x1a8   :  { %v171_v60 = vadd.f32 %v151_v59, %v70_v57  ;;  %v170_v61 = vadd.f32 %v149_v2, %v69_v58 }
 0x1aa   :  { %180 = vst.msk [vmem:[#allocation7 + $0x18] sm:$0xff] %vm176_vm1, %v171_v60  ;;  %179 = vst.msk [vmem:[#allocation7 + $0x10] sm:$0xff] %vm176_vm1, %v170_v61 }
 0x1ab   :  { %v155_v3 = vpop.permute.xlu0 %154  ;;  %v153_v1 = vpop.permute.xlu1 %152 }
 0x1ac   :  { %v173_v63 = vadd.f32 %v155_v3, %v72_v0  ;;  %v172_v16 = vadd.f32 %v153_v1, %v71_v62 }
 0x1ae   :  { %182 = vst.msk [vmem:[#allocation7 + $0x28] sm:$0xff] %vm176_vm1, %v173_v63  ;;  %181 = vst.msk [vmem:[#allocation7 + $0x20] sm:$0xff] %vm176_vm1, %v172_v16 }
 0x1af   :  { %v159_v4 = vpop.permute.xlu0 %158  ;;  %v157_v5 = vpop.permute.xlu1 %156 }
 0x1b0   :  { %v175_v19 = vadd.f32 %v159_v4, %v74_v17  ;;  %v174_v20 = vadd.f32 %v157_v5, %v73_v18 }
 0x1b2   :  { %184 = vst.msk [vmem:[#allocation7 + $0x38] sm:$0xff] %vm176_vm1, %v175_v19  ;;  %183 = vst.msk [vmem:[#allocation7 + $0x30] sm:$0xff] %vm176_vm1, %v174_v20 }
 0x1b3   :  { %v260_v6 = vpop.permute.xlu0 %259  ;;  %v258_v7 = vpop.permute.xlu1 %257 }
 0x1b4   :  { %395 = shalt.err (!%p392_p6)
}
 0x1b5   :  { %s396_s27 = scalar_lea.hbm %s755_s4, 1024 }
 0x1b6   :  { %p397_p7 = scmp.ne.s32.totalorder %s755_s4, %s396_s27  ;;  %p400_p8 = scmp.lt.u32.totalorder %s396_s27, %s755_s4 }
 0x1b8   :  { %p402_p9 = pnand %p400_p8, %p397_p7 }
 0x1ba   :  { %405 = shalt.err (!%p402_p9)
}
 0x1bb   :  { %308 = dma.vmem_to_hbm [thread:$0]  %s303_s23, 1024, %s755_s4, [#allocation4], %s437_s28, %s437_s28, %s438_s29   ;;  %v282_v8 = vadd.f32 %v260_v6, %v186_v21  ;;  %v281_v9 = vadd.f32 %v258_v7, %v185_v22  ;;  %v188_v23 = vmul.f32 %v671_v50, %v547_v11  ;;  %v187_v24 = vmul.f32 %v671_v50, %v545_v10  ;;  %v264_v25 = vpop.permute.xlu0 %263  ;;  %v262_v26 = vpop.permute.xlu1 %261 }
 0x1bc   :  { %v190_v29 = vmul.f32 %v671_v50, %v555_v13  ;;  %v189_v30 = vmul.f32 %v671_v50, %v553_v12  ;;  %v192_v33 = vmul.f32 %v671_v50, %v563_v15  ;;  %v191_v34 = vmul.f32 %v671_v50, %v561_v14  ;;  %s444_s4 = smov [#allocation8]  }
 0x1bd   :  { %290 = vst.msk [vmem:[#allocation8 + $0x8] sm:$0xff] %vm176_vm1, %v282_v8  ;;  %289 = vst.msk [vmem:[#allocation8] sm:$0xff] %vm176_vm1, %v281_v9  ;;  %v284_v27 = vadd.f32 %v264_v25, %v188_v23  ;;  %v283_v28 = vadd.f32 %v262_v26, %v187_v24  ;;  %s314_s11 = sshll.u32 %s444_s4, 4  ;;  %s315_s11 = int_to_ptr.vmem [resolvable:$true] %s314_s11 }
 0x1be   :  { %s406_s12 = scalar_lea.vmem %s315_s11, 1024  ;;  %p411_p11 = scmp.lt.s32.totalorder %s315_s11, %s315_s11 }
 0x1bf   :  { %292 = vst.msk [vmem:[#allocation8 + $0x18] sm:$0xff] %vm176_vm1, %v284_v27  ;;  %291 = vst.msk [vmem:[#allocation8 + $0x10] sm:$0xff] %vm176_vm1, %v283_v28  ;;  %v268_v11 = vpop.permute.xlu0 %267  ;;  %v266_v10 = vpop.permute.xlu1 %265  ;;  %p407_p10 = scmp.ne.s32.totalorder %s315_s11, %s406_s12  ;;  %p412_p12 = scmp.lt.s32.totalorder %s406_s12, %s406_s12 }
 0x1c0   :  { %v286_v31 = vadd.f32 %v268_v11, %v190_v29  ;;  %v285_v32 = vadd.f32 %v266_v10, %v189_v30 }
 0x1c1   :  { %p413_p13 = por %p412_p12, %p411_p11 }
 0x1c2   :  { %294 = vst.msk [vmem:[#allocation8 + $0x28] sm:$0xff] %vm176_vm1, %v286_v31  ;;  %293 = vst.msk [vmem:[#allocation8 + $0x20] sm:$0xff] %vm176_vm1, %v285_v32 }
 0x1c3   :  { %v272_v12 = vpop.permute.xlu0 %271  ;;  %v270_v13 = vpop.permute.xlu1 %269  ;;  %p414_p0 = pnand %p413_p13, %p407_p10 }
 0x1c4   :  { %v288_v35 = vadd.f32 %v272_v12, %v192_v33  ;;  %v287_v36 = vadd.f32 %v270_v13, %v191_v34 }
 0x1c6   :  { %296 = vst.msk [vmem:[#allocation8 + $0x38] sm:$0xff] %vm176_vm1, %v288_v35  ;;  %295 = vst.msk [vmem:[#allocation8 + $0x30] sm:$0xff] %vm176_vm1, %v287_v36 }
 0x1c7   :  { %417 = shalt.err (!%p414_p0)
}
 0x1c8   :  { %s418_s15 = scalar_lea.hbm %s756_s5, 1024 }
 0x1c9   :  { %p419_p1 = scmp.ne.s32.totalorder %s756_s5, %s418_s15  ;;  %p422_p2 = scmp.lt.u32.totalorder %s418_s15, %s756_s5 }
 0x1cb   :  { %p424_p3 = pnand %p422_p2, %p419_p1 }
 0x1cd   :  { %427 = shalt.err (!%p424_p3)
}
 0x1ce   :  { %320 = dma.vmem_to_hbm [thread:$0]  %s315_s11, 1024, %s756_s5, [#allocation9], %s437_s28, %s437_s28, %s438_s29  }
 0x1cf   :  { %432 = dma.done.wait [#allocation4], 1024  }
 0x1d0   :  { %433 = vsyncadd [#allocation4], 4294966272 }
 0x1d1   :  { %434 = dma.done.wait [#allocation9], 1024  }
 0x1d2   :  { %435 = vsyncadd [#allocation9], 4294966272 }
 0x1d3   :  { %327 = vsyncpa [#allocation3], 1 }
 0x1d4   :  { %328 = vsyncpa [#allocation6], 1 }
 0x1d5   :  { %329 = vsyncpa [#allocation4], 1 }
 0x1d6   :  { %330 = vsyncpa [#allocation9], 1 }

</bundles_post_ra>
